<compile_context>
chip_gen: v6e
topology: v6e:2x2x1
jax: 0.10.0
libtpu: 0.0.40
codegen_flags: <defaults>
</compile_context>

<pallas_src>
import math
from functools import partial

import jax
import jax.numpy as jnp
from jax import lax
from jax.experimental import pallas as pl
from jax.experimental.pallas import tpu as pltpu


# ----------------------------------------------------------------------------
# Fused kernel.
#
# Sub-pixel ("blocked") representation: the 2x-upsampled image Y (K, 2H, 2W) is
# held as 4 low-res planes P_k (K, H*W), k = i*2+j, with Y[:, 2h+i, 2w+j] =
# P_k[:, h*W+w].  The 3x3 SAME conv on Y decomposes per output sub-position
# (oi, oj) into 9 taps, each reading source plane (si, sj) = ((oi+ky-1)%2,
# (oj+kx-1)%2) shifted by (rh, rw) = ((oi+ky-1)//2, (oj+kx-1)//2), zero fill at
# the borders.  All spatial data lives in lanes (H*W wide); channels in sublanes.
# ----------------------------------------------------------------------------
def _fused_decoder_kernel(x_ref, widx_ref, wbig_ref, bbig_ref, wcatt_ref,
                          bcat_ref, g_ref, bt_ref, o_ref,
                          *, H, W, Cin, Cout, eps, nb):
    f32 = jnp.float32
    HW = H * W
    K2 = 2 * Cout

    wbig = wbig_ref[...].astype(f32)       # (4*K2, 5*Cin)
    bbig = bbig_ref[...].astype(f32)       # (4*K2, 1)
    wcatt = wcatt_ref[...].astype(f32)     # (Cout, 9*K2)
    bcat = bcat_ref[...].astype(f32)       # (Cout, 1)
    gamma = g_ref[...].astype(f32)         # (Cout, 4*HW)
    beta = bt_ref[...].astype(f32)         # (Cout, 4*HW)

    # Lane-index masks (hoisted out of the sample loop; spatial axis is in lanes).
    lane = lax.broadcasted_iota(jnp.int32, (1, HW), 1)
    w_idx = widx_ref[...]                              # (1, HW) int32: lane % W
    first_row = lane < W
    last_row = lane >= (H - 1) * W
    first_col = w_idx == 0
    last_col = w_idx == (W - 1)
    not_first_row = jnp.logical_not(first_row)
    not_last_row = jnp.logical_not(last_row)
    not_first_col = jnp.logical_not(first_col)
    not_last_col = jnp.logical_not(last_col)

    def roll_l(a, s):
        # roll along the lane (flattened H*W) axis; always a positive static shift.
        s = s % HW
        if s == 0:
            return a
        return pltpu.roll(a, s, axis=1)    # XLU lane rotate (jnp.roll semantics)

    inv_n = 1.0 / float(Cout * 4 * HW)

    for smp in range(nb):
        x = x_ref[smp].astype(f32)                                 # (Cin, HW)

        # ---- bilinear 2x branch (align_corners=False => 0.75/0.25, edge clamp),
        #      4 sub-pixel planes, all in (Cin, HW).
        x_rm = jnp.where(first_row, x, roll_l(x, W))               # row h-1 clamp
        x_rp = jnp.where(last_row, x, roll_l(x, -W))               # row h+1 clamp
        u_r0 = 0.75 * x + 0.25 * x_rm                              # output rows 2h
        u_r1 = 0.75 * x + 0.25 * x_rp                              # output rows 2h+1

        def col_mix(u):
            u_cm = jnp.where(first_col, u, roll_l(u, 1))           # col w-1 clamp
            u_cp = jnp.where(last_col, u, roll_l(u, -1))           # col w+1 clamp
            return 0.75 * u + 0.25 * u_cm, 0.75 * u + 0.25 * u_cp

        u00, u01 = col_mix(u_r0)
        u10, u11 = col_mix(u_r1)

        # ---- folded pixel-shuffle 1x1s + upsample 1x1 + channel concat as ONE
        #      lane-dense matmul: (4*2Cout, 5*Cin) @ (5*Cin, HW).
        x_big = jnp.concatenate([x, u00, u01, u10, u11], axis=0)   # (5*Cin, HW)
        cat_all = jnp.dot(wbig, x_big,
                          preferred_element_type=f32) + bbig       # (4*K2, HW)
        cat = [cat_all[k * K2:(k + 1) * K2] for k in range(4)]     # 4x (2Cout, HW)

        # ---- 3x3 SAME conv on the virtual 2x image, sub-pixel decomposed.
        shifted_cache = {}

        def shifted(si, sj, rh, rw):
            key = (si, sj, rh, rw)
            if key in shifted_cache:
                return shifted_cache[key]
            p = cat[si * 2 + sj]
            if rh == 0 and rw == 0:
                res = p
            else:
                rolled = roll_l(p, -(rh * W + rw))
                conds = []
                if rh == -1:
                    conds.append(not_first_row)
                elif rh == 1:
                    conds.append(not_last_row)
                if rw == -1:
                    conds.append(not_first_col)
                elif rw == 1:
                    conds.append(not_last_col)
                mask = conds[0]
                for c in conds[1:]:
                    mask = jnp.logical_and(mask, c)
                res = jnp.where(mask, rolled, 0.0)
            shifted_cache[key] = res
            return res

        slabs = []
        for oi in range(2):
            for oj in range(2):
                taps = []
                for ky in range(3):
                    si = (oi + ky - 1) % 2
                    rh = (oi + ky - 1) // 2
                    for kx in range(3):
                        sj = (oj + kx - 1) % 2
                        rw = (oj + kx - 1) // 2
                        taps.append(shifted(si, sj, rh, rw))
                # sublane-aligned stack: 9 taps x (2Cout, HW) -> (9*2Cout, HW)
                slabs.append(jnp.concatenate(taps, axis=0))
        slab_all = jnp.concatenate(slabs, axis=1)                  # (9*K2, 4*HW)
        out_all = jnp.dot(wcatt, slab_all,
                          preferred_element_type=f32) + bcat       # (Cout, 4*HW)

        # ---- LayerNorm over the whole (Cout, 2H, 2W) sample, one-pass stats.
        s1 = jnp.sum(out_all)
        s2 = jnp.sum(out_all * out_all)
        mean = s1 * inv_n
        var = s2 * inv_n - mean * mean                             # biased (torch LN)
        y = (out_all - mean) * lax.rsqrt(var + eps)
        y = y * gamma + beta
        # Dropout2d(p=0.0) == identity.
        # TODO(synk): DEFAULT_ACT assumed ReLU6; change the clip if different.
        o_ref[smp] = jnp.clip(y, 0.0, 6.0).astype(o_ref.dtype)


# ----------------------------------------------------------------------------
# Wrapper: weight folding / fusion, param re-layout, one pallas_call, un-blocking.
# ----------------------------------------------------------------------------
def multi_decoder_2d(x_nchw, params, kernel_size=2, eps=1e-5, samples_per_step=1):
    assert kernel_size == 2, "only the module default kernel_size=2 is implemented"
    r, rr = 2, 4
    N, Cin, H, W = x_nchw.shape
    Cout = params["w_post_ps"].shape[1]
    HW = H * W
    K2 = 2 * Cout
    nb = samples_per_step
    assert N % nb == 0

    # NCHW -> (N, Cin, H*W): pure reshape (spatial goes straight into lanes).
    x_flat = x_nchw.reshape(N, Cin, HW)

    w_pre, b_pre = params["w_pre_ps"], params["b_pre_ps"]     # (Cin, Cin*4), (Cin*4,)
    w_post, b_post = params["w_post_ps"], params["b_post_ps"]  # (Cin, Cout), (Cout,)
    wup, bup = params["w_up"], params["b_up"]                 # (Cin, Cout), (Cout,)

    # Fused weight: cat plane k = [ folded PS 1x1 (x) ; upsample 1x1 (u_k) ].
    # One (4*2Cout, 5*Cin) matrix applied to [x; u00; u01; u10; u11].
    wbig = jnp.zeros((rr * K2, (1 + rr) * Cin), jnp.float32)
    bbig = jnp.zeros((rr * K2, 1), jnp.float32)
    for k in range(rr):
        # PixelShuffle channel mapping: plane k=i*2+j uses pre-PS channels c*4+k.
        weff_k = w_pre[:, k::rr] @ w_post                     # (Cin, Cout)
        beff_k = b_pre[k::rr] @ w_post + b_post               # (Cout,)
        wbig = wbig.at[k * K2:k * K2 + Cout, 0:Cin].set(weff_k.T)
        wbig = wbig.at[k * K2 + Cout:(k + 1) * K2,
                       (1 + k) * Cin:(2 + k) * Cin].set(wup.T)
        bbig = bbig.at[k * K2:k * K2 + Cout, 0].set(beff_k)
        bbig = bbig.at[k * K2 + Cout:(k + 1) * K2, 0].set(bup)

    wcatt = params["w_cat"].reshape(9 * K2, Cout).T           # (Cout, 9*2Cout)
    bcat = params["b_cat"].reshape(Cout, 1)

    # LayerNorm affine (Cout, 2H, 2W) -> sub-pixel-blocked (Cout, 4*H*W) layout
    # matching the kernel's lane ordering: k*HW + h*W + w, k = i*2+j.
    def blockify(t):
        t = t.reshape(Cout, H, r, W, r)                       # c, h, i, w, j
        t = jnp.transpose(t, (0, 2, 4, 1, 3))                 # c, i, j, h, w
        return t.reshape(Cout, rr * HW)

    g_b = blockify(params["ln_gamma"])
    bt_b = blockify(params["ln_beta"])

    # Static column-index map (avoids in-kernel integer rem on the lane iota).
    w_idx = (jnp.arange(HW, dtype=jnp.int32) % W).reshape(1, HW)

    grid_n = N // nb
    out = pl.pallas_call(
        partial(_fused_decoder_kernel, H=H, W=W, Cin=Cin, Cout=Cout,
                eps=eps, nb=nb),
        out_shape=jax.ShapeDtypeStruct((N, Cout, rr * HW), x_nchw.dtype),
        grid=(grid_n,),
        in_specs=[
            pl.BlockSpec((nb, Cin, HW), lambda n: (n, 0, 0)),          # x
            pl.BlockSpec((1, HW), lambda n: (0, 0)),                   # lane % W
            pl.BlockSpec((rr * K2, (1 + rr) * Cin), lambda n: (0, 0)), # fused 1x1 W
            pl.BlockSpec((rr * K2, 1), lambda n: (0, 0)),              # fused 1x1 b
            pl.BlockSpec((Cout, 9 * K2), lambda n: (0, 0)),            # 3x3 conv W^T
            pl.BlockSpec((Cout, 1), lambda n: (0, 0)),                 # 3x3 conv b
            pl.BlockSpec((Cout, rr * HW), lambda n: (0, 0)),           # LN gamma
            pl.BlockSpec((Cout, rr * HW), lambda n: (0, 0)),           # LN beta
        ],
        out_specs=pl.BlockSpec((nb, Cout, rr * HW), lambda n: (n, 0, 0)),
        compiler_params=pltpu.CompilerParams(dimension_semantics=("parallel",)),
    )(x_flat, w_idx, wbig, bbig, wcatt, bcat, g_b, bt_b)

    # sub-pixel-blocked (N, Cout, 4*H*W) -> NCHW (N, Cout, 2H, 2W): tiny fix-up.
    out = out.reshape(N, Cout, r, r, H, W)                    # n, c, i, j, h, w
    out = jnp.transpose(out, (0, 1, 4, 2, 5, 3))              # n, c, h, i, w, j
    return out.reshape(N, Cout, r * H, r * W)


# ----------------------------------------------------------------------------
# Pure-JAX reference (independent path: explicit PixelShuffle, lax.conv, LN).
# ----------------------------------------------------------------------------
def _bilinear2x_ref_nchw(x):
    N, C, H, W = x.shape
    xm = jnp.concatenate([x[:, :, :1, :], x[:, :, :-1, :]], axis=2)
    xp = jnp.concatenate([x[:, :, 1:, :], x[:, :, -1:, :]], axis=2)
    r0 = 0.75 * x + 0.25 * xm
    r1 = 0.75 * x + 0.25 * xp
    rows = jnp.stack([r0, r1], axis=3).reshape(N, C, 2 * H, W)
    cm = jnp.concatenate([rows[..., :1], rows[..., :-1]], axis=-1)
    cp = jnp.concatenate([rows[..., 1:], rows[..., -1:]], axis=-1)
    c0 = 0.75 * rows + 0.25 * cm
    c1 = 0.75 * rows + 0.25 * cp
    return jnp.stack([c0, c1], axis=4).reshape(N, C, 2 * H, 2 * W)


def reference_forward(x_nchw, params, eps=1e-5):
    N, Cin, H, W = x_nchw.shape
    Cout = params["w_post_ps"].shape[1]
    hi = lax.Precision.HIGHEST

    def conv1x1(x, w, b):
        return jnp.einsum("nchw,cd->ndhw", x, w, precision=hi) + b[None, :, None, None]

    t = conv1x1(x_nchw, params["w_pre_ps"], params["b_pre_ps"])
    r = 2
    cmid = t.shape[1] // (r * r)
    t = t.reshape(N, cmid, r, r, H, W).transpose(0, 1, 4, 2, 5, 3)
    t = t.reshape(N, cmid, r * H, r * W)
    ps = conv1x1(t, params["w_post_ps"], params["b_post_ps"])

    up = conv1x1(_bilinear2x_ref_nchw(x_nchw), params["w_up"], params["b_up"])

    cat = jnp.concatenate([ps, up], axis=1)
    out = lax.conv_general_dilated(cat, params["w_cat"], (1, 1), "SAME",
                                   dimension_numbers=("NCHW", "HWIO", "NCHW"),
                                   precision=hi)
    out = out + params["b_cat"][None, :, None, None]

    mean = jnp.mean(out, axis=(1, 2, 3), keepdims=True)
    var = jnp.mean(jnp.square(out - mean), axis=(1, 2, 3), keepdims=True)
    out = (out - mean) * lax.rsqrt(var + eps)
    out = out * params["ln_gamma"][None] + params["ln_beta"][None]
    return jnp.clip(out, 0.0, 6.0)


# ----------------------------------------------------------------------------
# Deterministic parameter init (shapes follow the module's __init__).
# ----------------------------------------------------------------------------
def init_params(key, in_ch, out_ch, h, w, r=2):
    ks = jax.random.split(key, 10)

    def u(k, shape, fan_in):
        bound = 1.0 / math.sqrt(fan_in)
        return jax.random.uniform(k, shape, jnp.float32, -bound, bound)

    c_mid = in_ch * r * r
    p = {}
    p["w_pre_ps"] = u(ks[0], (in_ch, c_mid), in_ch)            # 1x1, stored (Cin, Cout)
    p["b_pre_ps"] = u(ks[1], (c_mid,), in_ch)
    p["w_post_ps"] = u(ks[2], (in_ch, out_ch), in_ch)
    p["b_post_ps"] = u(ks[3], (out_ch,), in_ch)
    p["w_up"] = u(ks[4], (in_ch, out_ch), in_ch)
    p["b_up"] = u(ks[5], (out_ch,), in_ch)
    p["w_cat"] = u(ks[6], (3, 3, 2 * out_ch, out_ch), 2 * out_ch * 9)   # HWIO
    p["b_cat"] = u(ks[7], (out_ch,), 2 * out_ch * 9)
    p["ln_gamma"] = 1.0 + 0.1 * jax.random.normal(ks[8], (out_ch, r * h, r * w), jnp.float32)
    p["ln_beta"] = 0.1 * jax.random.normal(ks[9], (out_ch, r * h, r * w), jnp.float32)
    return p


if __name__ == "__main__":
    N, Cin, Cout, H, W = 2, 4, 4, 16, 16
    key = jax.random.PRNGKey(0)
    kx, kp = jax.random.split(key)
    x = jax.random.normal(kx, (N, Cin, H, W), jnp.float32)     # NCHW like PyTorch
    params = init_params(kp, Cin, Cout, H, W, r=2)

    ref = reference_forward(x, params)
    jax.block_until_ready(ref)

    # samples_per_step=1: grid=(2,) "parallel" (even split on v7x's 2 TCs).
    # samples_per_step=2: grid=(1,) (amortizes per-step overhead on v5e/v6e).
    for nb in (1, 2):
        fwd = jax.jit(partial(multi_decoder_2d, kernel_size=2, samples_per_step=nb))
        out = fwd(x, params)
        jax.block_until_ready(out)

        assert out.shape == (N, Cout, 2 * H, 2 * W), out.shape
        assert out.dtype == jnp.float32
        assert bool(jnp.all(jnp.isfinite(out)))
        max_err = float(jnp.max(jnp.abs(out - ref)))
        assert max_err < 5e-2, f"samples_per_step={nb}: max abs err vs reference = {max_err}"

    print("KERNEL_OK")
</pallas_src>

<mosaic_0001>
module attributes {stable_mosaic.version = 11 : i64} {
  func.func @_fused_decoder_kernel(%arg0: i32, %arg1: memref<1x4x256xf32, #tpu.memory_space<vmem>>, %arg2: memref<1x256xi32, #tpu.memory_space<vmem>>, %arg3: memref<32x20xf32, #tpu.memory_space<vmem>>, %arg4: memref<32x1xf32, #tpu.memory_space<vmem>>, %arg5: memref<4x72xf32, #tpu.memory_space<vmem>>, %arg6: memref<4x1xf32, #tpu.memory_space<vmem>>, %arg7: memref<4x1024xf32, #tpu.memory_space<vmem>>, %arg8: memref<4x1024xf32, #tpu.memory_space<vmem>>, %arg9: memref<1x4x1024xf32, #tpu.memory_space<vmem>>) attributes {dimension_semantics = [#tpu.dimension_semantics<parallel>], iteration_bounds = array<i64: 2>, scalar_prefetch = 0 : i64, scratch_operands = 0 : i64, tpu.core_type = #tpu.core_type<tc>, window_params = [{transform_indices = @transform_0, window_bounds = array<i64: 1, 4, 256>}, {pipeline_mode = #tpu.pipeline_mode<synchronous>, transform_indices = @transform_1, window_bounds = array<i64: 1, 256>}, {pipeline_mode = #tpu.pipeline_mode<synchronous>, transform_indices = @transform_2, window_bounds = array<i64: 32, 20>}, {pipeline_mode = #tpu.pipeline_mode<synchronous>, transform_indices = @transform_3, window_bounds = array<i64: 32, 1>}, {pipeline_mode = #tpu.pipeline_mode<synchronous>, transform_indices = @transform_4, window_bounds = array<i64: 4, 72>}, {pipeline_mode = #tpu.pipeline_mode<synchronous>, transform_indices = @transform_5, window_bounds = array<i64: 4, 1>}, {pipeline_mode = #tpu.pipeline_mode<synchronous>, transform_indices = @transform_6, window_bounds = array<i64: 4, 1024>}, {pipeline_mode = #tpu.pipeline_mode<synchronous>, transform_indices = @transform_7, window_bounds = array<i64: 4, 1024>}, {transform_indices = @transform_8, window_bounds = array<i64: 1, 4, 1024>}]} {
    %c0 = arith.constant 0 : index
    %c0_0 = arith.constant 0 : index
    %0 = vector.load %arg3[%c0, %c0_0] : memref<32x20xf32, #tpu.memory_space<vmem>>, vector<32x20xf32>
    %c0_1 = arith.constant 0 : index
    %c0_2 = arith.constant 0 : index
    %1 = vector.load %arg4[%c0_1, %c0_2] : memref<32x1xf32, #tpu.memory_space<vmem>>, vector<32x1xf32>
    %c0_3 = arith.constant 0 : index
    %c0_4 = arith.constant 0 : index
    %2 = vector.load %arg5[%c0_3, %c0_4] : memref<4x72xf32, #tpu.memory_space<vmem>>, vector<4x72xf32>
    %c0_5 = arith.constant 0 : index
    %c0_6 = arith.constant 0 : index
    %3 = vector.load %arg6[%c0_5, %c0_6] : memref<4x1xf32, #tpu.memory_space<vmem>>, vector<4x1xf32>
    %c0_7 = arith.constant 0 : index
    %c0_8 = arith.constant 0 : index
    %4 = vector.load %arg7[%c0_7, %c0_8] : memref<4x1024xf32, #tpu.memory_space<vmem>>, vector<4x1024xf32>
    %c0_9 = arith.constant 0 : index
    %c0_10 = arith.constant 0 : index
    %5 = vector.load %arg8[%c0_9, %c0_10] : memref<4x1024xf32, #tpu.memory_space<vmem>>, vector<4x1024xf32>
    %6 = tpu.iota {dimensions = array<i32: 1>} : vector<1x256xi32>
    %c0_11 = arith.constant 0 : index
    %c0_12 = arith.constant 0 : index
    %7 = vector.load %arg2[%c0_11, %c0_12] : memref<1x256xi32, #tpu.memory_space<vmem>>, vector<1x256xi32>
    %c16_i32 = arith.constant 16 : i32
    %8 = vector.broadcast %c16_i32 : i32 to vector<1x256xi32>
    %9 = arith.cmpi slt, %6, %8 : vector<1x256xi32>
    %c240_i32 = arith.constant 240 : i32
    %10 = vector.broadcast %c240_i32 : i32 to vector<1x256xi32>
    %11 = arith.cmpi sge, %6, %10 : vector<1x256xi32>
    %c0_i32 = arith.constant 0 : i32
    %12 = vector.broadcast %c0_i32 : i32 to vector<1x256xi32>
    %13 = arith.cmpi eq, %7, %12 : vector<1x256xi32>
    %c15_i32 = arith.constant 15 : i32
    %14 = vector.broadcast %c15_i32 : i32 to vector<1x256xi32>
    %15 = arith.cmpi eq, %7, %14 : vector<1x256xi32>
    %cst = arith.constant dense<true> : vector<1x256xi1>
    %16 = arith.xori %9, %cst : vector<1x256xi1>
    %cst_13 = arith.constant dense<true> : vector<1x256xi1>
    %17 = arith.xori %11, %cst_13 : vector<1x256xi1>
    %cst_14 = arith.constant dense<true> : vector<1x256xi1>
    %18 = arith.xori %13, %cst_14 : vector<1x256xi1>
    %cst_15 = arith.constant dense<true> : vector<1x256xi1>
    %19 = arith.xori %15, %cst_15 : vector<1x256xi1>
    %c0_16 = arith.constant 0 : index
    %c0_17 = arith.constant 0 : index
    %c0_18 = arith.constant 0 : index
    %20 = vector.load %arg1[%c0_16, %c0_17, %c0_18] : memref<1x4x256xf32, #tpu.memory_space<vmem>>, vector<1x4x256xf32>
    %21 = vector.shape_cast %20 : vector<1x4x256xf32> to vector<4x256xf32>
    %c16_i32_19 = arith.constant 16 : i32
    %22 = tpu.dynamic_rotate %21 by %c16_i32_19 dim 1 : vector<4x256xf32>, i32 -> vector<4x256xf32>
    %23 = vector.shape_cast %9 : vector<1x256xi1> to vector<1x256xi1>
    %24 = vector.broadcast %23 : vector<1x256xi1> to vector<4x256xi1>
    %25 = arith.select %24, %21, %22 : vector<4x256xi1>, vector<4x256xf32>
    %c240_i32_20 = arith.constant 240 : i32
    %26 = tpu.dynamic_rotate %21 by %c240_i32_20 dim 1 : vector<4x256xf32>, i32 -> vector<4x256xf32>
    %27 = vector.shape_cast %11 : vector<1x256xi1> to vector<1x256xi1>
    %28 = vector.broadcast %27 : vector<1x256xi1> to vector<4x256xi1>
    %29 = arith.select %28, %21, %26 : vector<4x256xi1>, vector<4x256xf32>
    %cst_21 = arith.constant 7.500000e-01 : f32
    %30 = vector.broadcast %cst_21 : f32 to vector<4x256xf32>
    %31 = arith.mulf %30, %21 : vector<4x256xf32>
    %cst_22 = arith.constant 2.500000e-01 : f32
    %32 = vector.broadcast %cst_22 : f32 to vector<4x256xf32>
    %33 = arith.mulf %32, %25 : vector<4x256xf32>
    %34 = arith.addf %31, %33 : vector<4x256xf32>
    %cst_23 = arith.constant 7.500000e-01 : f32
    %35 = vector.broadcast %cst_23 : f32 to vector<4x256xf32>
    %36 = arith.mulf %35, %21 : vector<4x256xf32>
    %cst_24 = arith.constant 2.500000e-01 : f32
    %37 = vector.broadcast %cst_24 : f32 to vector<4x256xf32>
    %38 = arith.mulf %37, %29 : vector<4x256xf32>
    %39 = arith.addf %36, %38 : vector<4x256xf32>
    %c1_i32 = arith.constant 1 : i32
    %40 = tpu.dynamic_rotate %34 by %c1_i32 dim 1 : vector<4x256xf32>, i32 -> vector<4x256xf32>
    %41 = vector.shape_cast %13 : vector<1x256xi1> to vector<1x256xi1>
    %42 = vector.broadcast %41 : vector<1x256xi1> to vector<4x256xi1>
    %43 = arith.select %42, %34, %40 : vector<4x256xi1>, vector<4x256xf32>
    %c255_i32 = arith.constant 255 : i32
    %44 = tpu.dynamic_rotate %34 by %c255_i32 dim 1 : vector<4x256xf32>, i32 -> vector<4x256xf32>
    %45 = vector.shape_cast %15 : vector<1x256xi1> to vector<1x256xi1>
    %46 = vector.broadcast %45 : vector<1x256xi1> to vector<4x256xi1>
    %47 = arith.select %46, %34, %44 : vector<4x256xi1>, vector<4x256xf32>
    %cst_25 = arith.constant 7.500000e-01 : f32
    %48 = vector.broadcast %cst_25 : f32 to vector<4x256xf32>
    %49 = arith.mulf %48, %34 : vector<4x256xf32>
    %cst_26 = arith.constant 2.500000e-01 : f32
    %50 = vector.broadcast %cst_26 : f32 to vector<4x256xf32>
    %51 = arith.mulf %50, %43 : vector<4x256xf32>
    %52 = arith.addf %49, %51 : vector<4x256xf32>
    %cst_27 = arith.constant 7.500000e-01 : f32
    %53 = vector.broadcast %cst_27 : f32 to vector<4x256xf32>
    %54 = arith.mulf %53, %34 : vector<4x256xf32>
    %cst_28 = arith.constant 2.500000e-01 : f32
    %55 = vector.broadcast %cst_28 : f32 to vector<4x256xf32>
    %56 = arith.mulf %55, %47 : vector<4x256xf32>
    %57 = arith.addf %54, %56 : vector<4x256xf32>
    %c1_i32_29 = arith.constant 1 : i32
    %58 = tpu.dynamic_rotate %39 by %c1_i32_29 dim 1 : vector<4x256xf32>, i32 -> vector<4x256xf32>
    %59 = vector.shape_cast %13 : vector<1x256xi1> to vector<1x256xi1>
    %60 = vector.broadcast %59 : vector<1x256xi1> to vector<4x256xi1>
    %61 = arith.select %60, %39, %58 : vector<4x256xi1>, vector<4x256xf32>
    %c255_i32_30 = arith.constant 255 : i32
    %62 = tpu.dynamic_rotate %39 by %c255_i32_30 dim 1 : vector<4x256xf32>, i32 -> vector<4x256xf32>
    %63 = vector.shape_cast %15 : vector<1x256xi1> to vector<1x256xi1>
    %64 = vector.broadcast %63 : vector<1x256xi1> to vector<4x256xi1>
    %65 = arith.select %64, %39, %62 : vector<4x256xi1>, vector<4x256xf32>
    %cst_31 = arith.constant 7.500000e-01 : f32
    %66 = vector.broadcast %cst_31 : f32 to vector<4x256xf32>
    %67 = arith.mulf %66, %39 : vector<4x256xf32>
    %cst_32 = arith.constant 2.500000e-01 : f32
    %68 = vector.broadcast %cst_32 : f32 to vector<4x256xf32>
    %69 = arith.mulf %68, %61 : vector<4x256xf32>
    %70 = arith.addf %67, %69 : vector<4x256xf32>
    %cst_33 = arith.constant 7.500000e-01 : f32
    %71 = vector.broadcast %cst_33 : f32 to vector<4x256xf32>
    %72 = arith.mulf %71, %39 : vector<4x256xf32>
    %cst_34 = arith.constant 2.500000e-01 : f32
    %73 = vector.broadcast %cst_34 : f32 to vector<4x256xf32>
    %74 = arith.mulf %73, %65 : vector<4x256xf32>
    %75 = arith.addf %72, %74 : vector<4x256xf32>
    %76 = tpu.concatenate %21, %52, %57, %70, %75 in 0 : vector<4x256xf32>, vector<4x256xf32>, vector<4x256xf32>, vector<4x256xf32>, vector<4x256xf32> -> vector<20x256xf32>
    %cst_35 = arith.constant dense<0.000000e+00> : vector<32x256xf32>
    %77 = tpu.matmul %0, %76, %cst_35 {dimension_numbers = #tpu.dot_dimension_numbers<[1], [0], [0], [1], [0, 0, 1, 1], [], []>} : vector<32x20xf32>, vector<20x256xf32>, vector<32x256xf32> -> vector<32x256xf32>
    %78 = vector.broadcast %1 : vector<32x1xf32> to vector<32x256xf32>
    %79 = arith.addf %77, %78 : vector<32x256xf32>
    %80 = vector.extract_strided_slice %79 {offsets = [0, 0], sizes = [8, 256], strides = [1, 1]} : vector<32x256xf32> to vector<8x256xf32>
    %81 = vector.extract_strided_slice %79 {offsets = [8, 0], sizes = [8, 256], strides = [1, 1]} : vector<32x256xf32> to vector<8x256xf32>
    %82 = vector.extract_strided_slice %79 {offsets = [16, 0], sizes = [8, 256], strides = [1, 1]} : vector<32x256xf32> to vector<8x256xf32>
    %83 = vector.extract_strided_slice %79 {offsets = [24, 0], sizes = [8, 256], strides = [1, 1]} : vector<32x256xf32> to vector<8x256xf32>
    %c17_i32 = arith.constant 17 : i32
    %84 = tpu.dynamic_rotate %83 by %c17_i32 dim 1 : vector<8x256xf32>, i32 -> vector<8x256xf32>
    %85 = arith.andi %16, %18 : vector<1x256xi1>
    %cst_36 = arith.constant 0.000000e+00 : f32
    %86 = vector.shape_cast %85 : vector<1x256xi1> to vector<1x256xi1>
    %87 = vector.broadcast %86 : vector<1x256xi1> to vector<8x256xi1>
    %88 = vector.broadcast %cst_36 : f32 to vector<8x256xf32>
    %89 = arith.select %87, %84, %88 : vector<8x256xi1>, vector<8x256xf32>
    %c16_i32_37 = arith.constant 16 : i32
    %90 = tpu.dynamic_rotate %82 by %c16_i32_37 dim 1 : vector<8x256xf32>, i32 -> vector<8x256xf32>
    %cst_38 = arith.constant 0.000000e+00 : f32
    %91 = vector.shape_cast %16 : vector<1x256xi1> to vector<1x256xi1>
    %92 = vector.broadcast %91 : vector<1x256xi1> to vector<8x256xi1>
    %93 = vector.broadcast %cst_38 : f32 to vector<8x256xf32>
    %94 = arith.select %92, %90, %93 : vector<8x256xi1>, vector<8x256xf32>
    %c16_i32_39 = arith.constant 16 : i32
    %95 = tpu.dynamic_rotate %83 by %c16_i32_39 dim 1 : vector<8x256xf32>, i32 -> vector<8x256xf32>
    %cst_40 = arith.constant 0.000000e+00 : f32
    %96 = vector.shape_cast %16 : vector<1x256xi1> to vector<1x256xi1>
    %97 = vector.broadcast %96 : vector<1x256xi1> to vector<8x256xi1>
    %98 = vector.broadcast %cst_40 : f32 to vector<8x256xf32>
    %99 = arith.select %97, %95, %98 : vector<8x256xi1>, vector<8x256xf32>
    %c1_i32_41 = arith.constant 1 : i32
    %100 = tpu.dynamic_rotate %81 by %c1_i32_41 dim 1 : vector<8x256xf32>, i32 -> vector<8x256xf32>
    %cst_42 = arith.constant 0.000000e+00 : f32
    %101 = vector.shape_cast %18 : vector<1x256xi1> to vector<1x256xi1>
    %102 = vector.broadcast %101 : vector<1x256xi1> to vector<8x256xi1>
    %103 = vector.broadcast %cst_42 : f32 to vector<8x256xf32>
    %104 = arith.select %102, %100, %103 : vector<8x256xi1>, vector<8x256xf32>
    %c1_i32_43 = arith.constant 1 : i32
    %105 = tpu.dynamic_rotate %83 by %c1_i32_43 dim 1 : vector<8x256xf32>, i32 -> vector<8x256xf32>
    %cst_44 = arith.constant 0.000000e+00 : f32
    %106 = vector.shape_cast %18 : vector<1x256xi1> to vector<1x256xi1>
    %107 = vector.broadcast %106 : vector<1x256xi1> to vector<8x256xi1>
    %108 = vector.broadcast %cst_44 : f32 to vector<8x256xf32>
    %109 = arith.select %107, %105, %108 : vector<8x256xi1>, vector<8x256xf32>
    %110 = tpu.concatenate %89, %94, %99, %104, %80, %81, %109, %82, %83 in 0 : vector<8x256xf32>, vector<8x256xf32>, vector<8x256xf32>, vector<8x256xf32>, vector<8x256xf32>, vector<8x256xf32>, vector<8x256xf32>, vector<8x256xf32>, vector<8x256xf32> -> vector<72x256xf32>
    %c15_i32_45 = arith.constant 15 : i32
    %111 = tpu.dynamic_rotate %82 by %c15_i32_45 dim 1 : vector<8x256xf32>, i32 -> vector<8x256xf32>
    %112 = arith.andi %16, %19 : vector<1x256xi1>
    %cst_46 = arith.constant 0.000000e+00 : f32
    %113 = vector.shape_cast %112 : vector<1x256xi1> to vector<1x256xi1>
    %114 = vector.broadcast %113 : vector<1x256xi1> to vector<8x256xi1>
    %115 = vector.broadcast %cst_46 : f32 to vector<8x256xf32>
    %116 = arith.select %114, %111, %115 : vector<8x256xi1>, vector<8x256xf32>
    %c255_i32_47 = arith.constant 255 : i32
    %117 = tpu.dynamic_rotate %80 by %c255_i32_47 dim 1 : vector<8x256xf32>, i32 -> vector<8x256xf32>
    %cst_48 = arith.constant 0.000000e+00 : f32
    %118 = vector.shape_cast %19 : vector<1x256xi1> to vector<1x256xi1>
    %119 = vector.broadcast %118 : vector<1x256xi1> to vector<8x256xi1>
    %120 = vector.broadcast %cst_48 : f32 to vector<8x256xf32>
    %121 = arith.select %119, %117, %120 : vector<8x256xi1>, vector<8x256xf32>
    %c255_i32_49 = arith.constant 255 : i32
    %122 = tpu.dynamic_rotate %82 by %c255_i32_49 dim 1 : vector<8x256xf32>, i32 -> vector<8x256xf32>
    %cst_50 = arith.constant 0.000000e+00 : f32
    %123 = vector.shape_cast %19 : vector<1x256xi1> to vector<1x256xi1>
    %124 = vector.broadcast %123 : vector<1x256xi1> to vector<8x256xi1>
    %125 = vector.broadcast %cst_50 : f32 to vector<8x256xf32>
    %126 = arith.select %124, %122, %125 : vector<8x256xi1>, vector<8x256xf32>
    %127 = tpu.concatenate %94, %99, %116, %80, %81, %121, %82, %83, %126 in 0 : vector<8x256xf32>, vector<8x256xf32>, vector<8x256xf32>, vector<8x256xf32>, vector<8x256xf32>, vector<8x256xf32>, vector<8x256xf32>, vector<8x256xf32>, vector<8x256xf32> -> vector<72x256xf32>
    %c241_i32 = arith.constant 241 : i32
    %128 = tpu.dynamic_rotate %81 by %c241_i32 dim 1 : vector<8x256xf32>, i32 -> vector<8x256xf32>
    %129 = arith.andi %17, %18 : vector<1x256xi1>
    %cst_51 = arith.constant 0.000000e+00 : f32
    %130 = vector.shape_cast %129 : vector<1x256xi1> to vector<1x256xi1>
    %131 = vector.broadcast %130 : vector<1x256xi1> to vector<8x256xi1>
    %132 = vector.broadcast %cst_51 : f32 to vector<8x256xf32>
    %133 = arith.select %131, %128, %132 : vector<8x256xi1>, vector<8x256xf32>
    %c240_i32_52 = arith.constant 240 : i32
    %134 = tpu.dynamic_rotate %80 by %c240_i32_52 dim 1 : vector<8x256xf32>, i32 -> vector<8x256xf32>
    %cst_53 = arith.constant 0.000000e+00 : f32
    %135 = vector.shape_cast %17 : vector<1x256xi1> to vector<1x256xi1>
    %136 = vector.broadcast %135 : vector<1x256xi1> to vector<8x256xi1>
    %137 = vector.broadcast %cst_53 : f32 to vector<8x256xf32>
    %138 = arith.select %136, %134, %137 : vector<8x256xi1>, vector<8x256xf32>
    %c240_i32_54 = arith.constant 240 : i32
    %139 = tpu.dynamic_rotate %81 by %c240_i32_54 dim 1 : vector<8x256xf32>, i32 -> vector<8x256xf32>
    %cst_55 = arith.constant 0.000000e+00 : f32
    %140 = vector.shape_cast %17 : vector<1x256xi1> to vector<1x256xi1>
    %141 = vector.broadcast %140 : vector<1x256xi1> to vector<8x256xi1>
    %142 = vector.broadcast %cst_55 : f32 to vector<8x256xf32>
    %143 = arith.select %141, %139, %142 : vector<8x256xi1>, vector<8x256xf32>
    %144 = tpu.concatenate %104, %80, %81, %109, %82, %83, %133, %138, %143 in 0 : vector<8x256xf32>, vector<8x256xf32>, vector<8x256xf32>, vector<8x256xf32>, vector<8x256xf32>, vector<8x256xf32>, vector<8x256xf32>, vector<8x256xf32>, vector<8x256xf32> -> vector<72x256xf32>
    %c239_i32 = arith.constant 239 : i32
    %145 = tpu.dynamic_rotate %80 by %c239_i32 dim 1 : vector<8x256xf32>, i32 -> vector<8x256xf32>
    %146 = arith.andi %17, %19 : vector<1x256xi1>
    %cst_56 = arith.constant 0.000000e+00 : f32
    %147 = vector.shape_cast %146 : vector<1x256xi1> to vector<1x256xi1>
    %148 = vector.broadcast %147 : vector<1x256xi1> to vector<8x256xi1>
    %149 = vector.broadcast %cst_56 : f32 to vector<8x256xf32>
    %150 = arith.select %148, %145, %149 : vector<8x256xi1>, vector<8x256xf32>
    %151 = tpu.concatenate %80, %81, %121, %82, %83, %126, %138, %143, %150 in 0 : vector<8x256xf32>, vector<8x256xf32>, vector<8x256xf32>, vector<8x256xf32>, vector<8x256xf32>, vector<8x256xf32>, vector<8x256xf32>, vector<8x256xf32>, vector<8x256xf32> -> vector<72x256xf32>
    %152 = tpu.concatenate %110, %127, %144, %151 in 1 : vector<72x256xf32>, vector<72x256xf32>, vector<72x256xf32>, vector<72x256xf32> -> vector<72x1024xf32>
    %cst_57 = arith.constant dense<0.000000e+00> : vector<4x1024xf32>
    %153 = tpu.matmul %2, %152, %cst_57 {dimension_numbers = #tpu.dot_dimension_numbers<[1], [0], [0], [1], [0, 0, 1, 1], [], []>} : vector<4x72xf32>, vector<72x1024xf32>, vector<4x1024xf32> -> vector<4x1024xf32>
    %154 = vector.broadcast %3 : vector<4x1xf32> to vector<4x1024xf32>
    %155 = arith.addf %153, %154 : vector<4x1024xf32>
    %156 = vector.shape_cast %155 : vector<4x1024xf32> to vector<1x4x1024xf32>
    %cst_58 = arith.constant dense<0.000000e+00> : vector<1xf32>
    %157 = vector.multi_reduction <add>, %156, %cst_58 [1, 2] : vector<1x4x1024xf32> to vector<1xf32>
    %158 = vector.shape_cast %157 : vector<1xf32> to vector<1x1x1xf32>
    %159 = vector.extract %158[0, 0, 0] : f32 from vector<1x1x1xf32>
    %160 = arith.mulf %155, %155 : vector<4x1024xf32>
    %161 = vector.shape_cast %160 : vector<4x1024xf32> to vector<1x4x1024xf32>
    %cst_59 = arith.constant dense<0.000000e+00> : vector<1xf32>
    %162 = vector.multi_reduction <add>, %161, %cst_59 [1, 2] : vector<1x4x1024xf32> to vector<1xf32>
    %163 = vector.shape_cast %162 : vector<1xf32> to vector<1x1x1xf32>
    %164 = vector.extract %163[0, 0, 0] : f32 from vector<1x1x1xf32>
    %cst_60 = arith.constant 2.44140625E-4 : f32
    %165 = arith.mulf %159, %cst_60 : f32
    %cst_61 = arith.constant 2.44140625E-4 : f32
    %166 = arith.mulf %164, %cst_61 : f32
    %167 = arith.mulf %165, %165 : f32
    %168 = arith.subf %166, %167 : f32
    %169 = vector.broadcast %165 : f32 to vector<4x1024xf32>
    %170 = arith.subf %155, %169 : vector<4x1024xf32>
    %cst_62 = arith.constant 9.99999974E-6 : f32
    %171 = arith.addf %168, %cst_62 : f32
    %172 = math.rsqrt %171 : f32
    %173 = vector.broadcast %172 : f32 to vector<4x1024xf32>
    %174 = arith.mulf %170, %173 : vector<4x1024xf32>
    %175 = arith.mulf %174, %4 : vector<4x1024xf32>
    %176 = arith.addf %175, %5 : vector<4x1024xf32>
    %cst_63 = arith.constant 0.000000e+00 : f32
    %cst_64 = arith.constant 6.000000e+00 : f32
    %177 = vector.broadcast %cst_63 : f32 to vector<4x1024xf32>
    %178 = arith.maximumf %177, %176 : vector<4x1024xf32>
    %179 = vector.broadcast %cst_64 : f32 to vector<4x1024xf32>
    %180 = arith.minimumf %179, %178 : vector<4x1024xf32>
    %c0_65 = arith.constant 0 : index
    %c0_66 = arith.constant 0 : index
    %c0_67 = arith.constant 0 : index
    %181 = vector.load %arg9[%c0_65, %c0_66, %c0_67] : memref<1x4x1024xf32, #tpu.memory_space<vmem>>, vector<1x4x1024xf32>
    %182 = vector.shape_cast %181 : vector<1x4x1024xf32> to vector<4x1024xf32>
    %183 = vector.shape_cast %180 : vector<4x1024xf32> to vector<1x4x1024xf32>
    tpu.vector_store %arg9[%c0_65, %c0_66, %c0_67], %183 {strides = array<i32>} : memref<1x4x1024xf32, #tpu.memory_space<vmem>>, vector<1x4x1024xf32>,
    return
  }
  func.func @transform_0(%arg0: i32) -> (i32, i32, i32) {
    %c0_i32 = arith.constant 0 : i32
    %c0_i32_0 = arith.constant 0 : i32
    %c0_i32_1 = arith.constant 0 : i32
    return %arg0, %c0_i32, %c0_i32_0 : i32, i32, i32
  }
  func.func @transform_1(%arg0: i32) -> (i32, i32) {
    %c0_i32 = arith.constant 0 : i32
    %c0_i32_0 = arith.constant 0 : i32
    %c0_i32_1 = arith.constant 0 : i32
    return %c0_i32, %c0_i32_0 : i32, i32
  }
  func.func @transform_2(%arg0: i32) -> (i32, i32) {
    %c0_i32 = arith.constant 0 : i32
    %c0_i32_0 = arith.constant 0 : i32
    %c0_i32_1 = arith.constant 0 : i32
    return %c0_i32, %c0_i32_0 : i32, i32
  }
  func.func @transform_3(%arg0: i32) -> (i32, i32) {
    %c0_i32 = arith.constant 0 : i32
    %c0_i32_0 = arith.constant 0 : i32
    %c0_i32_1 = arith.constant 0 : i32
    return %c0_i32, %c0_i32_0 : i32, i32
  }
  func.func @transform_4(%arg0: i32) -> (i32, i32) {
    %c0_i32 = arith.constant 0 : i32
    %c0_i32_0 = arith.constant 0 : i32
    %c0_i32_1 = arith.constant 0 : i32
    return %c0_i32, %c0_i32_0 : i32, i32
  }
  func.func @transform_5(%arg0: i32) -> (i32, i32) {
    %c0_i32 = arith.constant 0 : i32
    %c0_i32_0 = arith.constant 0 : i32
    %c0_i32_1 = arith.constant 0 : i32
    return %c0_i32, %c0_i32_0 : i32, i32
  }
  func.func @transform_6(%arg0: i32) -> (i32, i32) {
    %c0_i32 = arith.constant 0 : i32
    %c0_i32_0 = arith.constant 0 : i32
    %c0_i32_1 = arith.constant 0 : i32
    return %c0_i32, %c0_i32_0 : i32, i32
  }
  func.func @transform_7(%arg0: i32) -> (i32, i32) {
    %c0_i32 = arith.constant 0 : i32
    %c0_i32_0 = arith.constant 0 : i32
    %c0_i32_1 = arith.constant 0 : i32
    return %c0_i32, %c0_i32_0 : i32, i32
  }
  func.func @transform_8(%arg0: i32) -> (i32, i32, i32) {
    %c0_i32 = arith.constant 0 : i32
    %c0_i32_0 = arith.constant 0 : i32
    %c0_i32_1 = arith.constant 0 : i32
    return %arg0, %c0_i32, %c0_i32_0 : i32, i32, i32
  }
}

</mosaic_0001>

<bundles_post_ra>
// kernel: multi_decoder_2d.1
= control target key start
LH: loop header
LB: loop body
LE: loop exit
PB: predicated region body
PF: predicated region fallthrough
CT: control target
= control target key end

     0   :  { %s1471_s27 = smov 0   ;;  %s2122_s0 = inlined_call_operand.vmem [shape: f32[2,4,256], index: 0, kind: input, shape index: {}]   ;;  %s2123_s1 = inlined_call_operand.vmem [shape: s32[1,256], index: 1, kind: input, shape index: {}]   ;;  %s2124_s2 = inlined_call_operand.vmem [shape: f32[32,20], index: 2, kind: input, shape index: {}]   ;;  %s2125_s3 = inlined_call_operand.vmem [shape: f32[32,1], index: 3, kind: input, shape index: {}]   ;;  %s2126_s4 = inlined_call_operand.vmem [shape: f32[4,72], index: 4, kind: input, shape index: {}]   ;;  %s2127_s5 = inlined_call_operand.vmem [shape: f32[4,1], index: 5, kind: input, shape index: {}]   ;;  %s2128_s6 = inlined_call_operand.vmem [shape: f32[4,1024], index: 6, kind: input, shape index: {}]   ;;  %s2129_s7 = inlined_call_operand.vmem [shape: f32[4,1024], index: 7, kind: input, shape index: {}]   ;;  %s2130_s8 = inlined_call_operand.vmem [shape: f32[2,4,1024], index: 8, kind: output, shape index: {}]  }
   0x1 LB: > { %s1314_s28 = sadd.s32 4294967295, %s1413_s27   ;;  %p1318_p0 = scmp.ge.s32.totalorder %s1413_s27, 1  ;;  %s1413_s27 = sphi %s1471_s27, %s18_s27  }
   0x2   : > { %p262_p1 = scmp.lt.s32.totalorder %s1413_s27, 3 }
   0x4   : > { %p263_p2 = pnand %p1318_p0, %p262_p1 }
   0x5   : > { %p296_p3 = scmp.lt.s32.totalorder (!%p263_p2), %s1314_s28, 1  ;;  %s1415_s11 = smov (!%p263_p2), 16  }
   0x6   : > { %266 = sbr.rel (%p263_p2) target bundleno = 1147 (0x47b), region = 52  ;;  %s1416_s12 = smov (!%p263_p2), 112  }
   0x7   : > { %s1418_s13 = smov (!%p263_p2), 127   ;;  %s1419_s14 = smov (!%p263_p2), 1  }
   0x8   : > { %s1421_s17 = smov (!%p263_p2), 15   ;;  %s1423_s18 = smov (!%p263_p2), 113  }
   0xb   : > { %s2171_s28 = smov (!%p296_p3, %s1314_s28), 1  ;;  %v324_v2 = vlaneseq  ;;  %v1417_v5 = vmov 0   ;;  %v1420_v27 = vmov 0.0   ;;  %v313_v28 = vld [vmem:[%s2125_s3 + $0x18] sm:$0xff]  ;;  %v312_v29 = vld [vmem:[%s2125_s3 + $0x10] sm:$0xff]  ;;  %v310_v30 = vld [vmem:[%s2125_s3] sm:$0xff] }
   0xc   : > { %s1367_s29 = sshll.u32 %s2171_s28, 3  ;;  %1395 = vset.pattern.permute.xlu1 %v1417_v5  ;;  %1394 = vset.pattern.permute.xlu0 %v1417_v5  ;;  %v311_v31 = vld [vmem:[%s2125_s3 + $0x8] sm:$0xff]  ;;  %v1569_v32 = vld [vmem:[%s2123_s1] sm:$0x3]  ;;  %vm2131_vm11 = vcmask 1043456   ;;  %vm512_vm12 = vcmask 162816  }
   0xd   : > { %s300_s10 = scalar_lea.vmem %s2122_s0, %s1367_s29  ;;  %v1499_v3 = vand.u32 127, %v324_v2  ;;  %593 = vmatprep.mubr.f32.mxu0 %v1420_v27  ;;  %881 = vmatprep.mubr.f32.mxu1 %v1420_v27  ;;  %v396_v33 = vshrl.u32 %v324_v2, 7  ;;  %vm333_vm3 = vcmp.eq.s32.totalorder %v1569_v32, 15  ;;  %vm332_vm4 = vcmp.eq.s32.totalorder %v1569_v32, 0 }
   0xe   : > { %v1485_v0 = vld [vmem:[%s300_s10] sm:$0xff]  ;;  %v414_v36 = vsel %vm333_vm3, 1, %v1417_v5  ;;  %v394_v42 = vsel %vm332_vm4, 1, %v1417_v5  ;;  %vm1425_vm13 = vmmov 1  }
   0xf   : > { %344 = vrot.lane.b32.xlu1 %v1485_v0, %s1415_s11  ;;  %356 = vrot.lane.b32.xlu0 %v1485_v0, %s1416_s12  ;;  %v1493_v1 = vcombine.high %v1485_v0, %v1485_v0  ;;  %v1502_v4 = vadd.s32 128, %v1499_v3  ;;  %vm328_vm0 = vcmp.lt.s32.totalorder %v1499_v3, 16  ;;  %vm360_vm1 = vcmp.lt.s32.totalorder %v1499_v3, 112  ;;  %vm339_vm14 = vmxor %vm333_vm3, %vm1425_vm13 }
  0x10   : > { %v369_v18 = vmul.f32 0.75, %v1485_v0  ;;  %v1572_v34 = vsub.s32 0, %v396_v33  ;;  %v1574_v35 = vsub.s32 1, %v396_v33  ;;  %vm411_vm5 = vcmp.lt.s32.totalorder %v1499_v3, 127  ;;  %vm1755_vm15 = vmxor %vm328_vm0, %vm1425_vm13 }
  0x11   : > { %vm331_vm2 = vcmp.ge.s32.totalorder %v1502_v4, 240  ;;  %vm391_vm8 = vcmp.lt.s32.totalorder %v1499_v3, 1 }
  0x12   : > { %v418_v37 = vrot.slane %v414_v36, %v1572_v34  ;;  %v422_v38 = vrot.slane %v414_v36, %v1574_v35  ;;  %v398_v49 = vrot.slane %v394_v42, %v1572_v34  ;;  %v402_v52 = vrot.slane %v394_v42, %v1574_v35  ;;  %v307_v42 = vld [vmem:[%s2124_s2 + $0x8] sm:$0xff] }
  0x13   : > { %346 = vrot.lane.b32.xlu1 %v1493_v1, %s1415_s11  ;;  %358 = vrot.lane.b32.xlu0 %v1493_v1, %s1416_s12 }
  0x14   : > { %vm1583_vm6 = vcmp.eq.s32.totalorder %v418_v37, 1  ;;  %vm1587_vm7 = vcmp.eq.s32.totalorder %v422_v38, 1  ;;  %vm1618_vm9 = vcmp.eq.s32.totalorder %v398_v49, 1  ;;  %vm1622_vm10 = vcmp.eq.s32.totalorder %v402_v52, 1 }
  0x81   : > { %v345_v6 = vpop.permute.xlu1 %344  ;;  %v357_v7 = vpop.permute.xlu0 %356 }
  0x85   : > { %v347_v8 = vpop.permute.xlu1 %346  ;;  %v359_v9 = vpop.permute.xlu0 %358 }
  0x86   : > { %v348_v10 = vsel %vm328_vm0, %v345_v6, %v347_v8  ;;  %v349_v11 = vsel %vm328_vm0, %v347_v8, %v345_v6  ;;  %v361_v12 = vsel %vm360_vm1, %v357_v7, %v359_v9  ;;  %v362_v13 = vsel %vm360_vm1, %v359_v9, %v357_v7 }
  0x87   : > { %v354_v14 = vsel %vm328_vm0, %v1485_v0, %v349_v11  ;;  %v371_v15 = vmul.f32 0.25, %v348_v10  ;;  %v368_v16 = vsel %vm331_vm2, %v1493_v1, %v362_v13  ;;  %v377_v17 = vmul.f32 0.25, %v361_v12 }
  0x88   : > { %v370_v19 = vmul.f32 0.25, %v354_v14  ;;  %v378_v20 = vmul.f32 0.25, %v368_v16 }
  0x8a   : > { %v374_v21 = vcombine.low %v370_v19, %v371_v15  ;;  %v381_v22 = vcombine.low %v377_v17, %v378_v20 }
  0x8c   : > { %v1524_v23 = vadd.f32 %v381_v22, %v369_v18  ;;  %v1526_v24 = vadd.f32 %v374_v21, %v369_v18 }
  0x8e   : > { %453 = vrot.lane.b32.xlu0 %v1524_v23, %s1418_s13  ;;  %v1532_v25 = vcombine.high %v1524_v23, %v1524_v23  ;;  %v1540_v26 = vcombine.high %v1526_v24, %v1526_v24  ;;  %v461_v56 = vmul.f32 0.75, %v1524_v23  ;;  %v427_v8 = vmul.f32 0.75, %v1526_v24 }
  0x90   : > { %455 = vrot.lane.b32.xlu1 %v1532_v25, %s1418_s13 }
  0x92   : > { %407 = vrot.lane.b32.xlu0 %v1526_v24, %s1418_s13 }
  0x94   : > { %409 = vrot.lane.b32.xlu1 %v1540_v26, %s1418_s13 }
  0x96   : > { %445 = vrot.lane.b32.xlu0 %v1524_v23, %s1419_s14 }
  0x98   : > { %447 = vrot.lane.b32.xlu1 %v1532_v25, %s1419_s14 }
  0x9a   : > { %387 = vrot.lane.b32.xlu0 %v1526_v24, %s1419_s14 }
  0x9c   : > { %389 = vrot.lane.b32.xlu1 %v1540_v26, %s1419_s14 }
  0x9e   : > { %504 = vperm.xlu0 %1394, %v312_v29  }
  0xa0   : > { %509 = vperm.xlu1 %1395, %v313_v28  }
  0xa2   : > { %499 = vperm.xlu0 %1394, %v311_v31  }
  0xa4   : > { %494 = vperm.xlu1 %1395, %v310_v30  }
 0x100   : > { %v454_v39 = vpop.permute.xlu0 %453 }
 0x102   : > { %v456_v43 = vpop.permute.xlu1 %455 }
 0x103   : > { %v457_v44 = vsel %vm411_vm5, %v454_v39, %v456_v43  ;;  %v458_v45 = vsel %vm411_vm5, %v456_v43, %v454_v39 }
 0x104   : > { %v459_v46 = vsel %vm1583_vm6, %v1524_v23, %v457_v44  ;;  %v460_v47 = vsel %vm1587_vm7, %v1532_v25, %v458_v45  ;;  %v408_v48 = vpop.permute.xlu0 %407 }
 0x105   : > { %v469_v50 = vmul.f32 0.25, %v459_v46  ;;  %v470_v51 = vmul.f32 0.25, %v460_v47 }
 0x106   : > { %v410_v53 = vpop.permute.xlu1 %409 }
 0x107   : > { %v412_v54 = vsel %vm411_vm5, %v408_v48, %v410_v53  ;;  %v413_v55 = vsel %vm411_vm5, %v410_v53, %v408_v48  ;;  %v473_v57 = vcombine.low %v469_v50, %v470_v51 }
 0x108   : > { %v425_v58 = vsel %vm1583_vm6, %v1526_v24, %v412_v54  ;;  %v426_v59 = vsel %vm1587_vm7, %v1540_v26, %v413_v55  ;;  %v446_v60 = vpop.permute.xlu0 %445 }
 0x109   : > { %v435_v62 = vmul.f32 0.25, %v425_v58  ;;  %v436_v63 = vmul.f32 0.25, %v426_v59  ;;  %v475_v6 = vadd.f32 %v473_v57, %v461_v56 }
 0x10a   : > { %v448_v7 = vpop.permute.xlu1 %447 }
 0x10b   : > { %v439_v9 = vcombine.low %v435_v62, %v436_v63  ;;  %v449_v10 = vsel %vm391_vm8, %v446_v60, %v448_v7  ;;  %v450_v11 = vsel %vm391_vm8, %v448_v7, %v446_v60  ;;  %v486_v12 = vcombine.high %v475_v6, %v475_v6  ;;  %v315_v63 = vld [vmem:[%s2127_s5] sm:$0xf] }
 0x10c   : > { %v451_v13 = vsel %vm1618_vm9, %v1524_v23, %v450_v11  ;;  %v452_v14 = vsel %vm1622_vm10, %v1532_v25, %v449_v10  ;;  %v388_v18 = vpop.permute.xlu0 %387 }
 0x10d   : > { %v462_v15 = vmul.f32 0.25, %v451_v13  ;;  %v463_v16 = vmul.f32 0.25, %v452_v14  ;;  %1323 = vmatprep.subr.msk.mxu0 %vm2131_vm11, %v486_v12  ;;  %v441_v17 = vadd.f32 %v439_v9, %v427_v8  ;;  %v697_v9 = vsel %vm339_vm14, 1, %v1417_v5 }
 0x10e   : > { %1324 = vmatpush1.msk.msra.mxu0 %vm2131_vm11, %v475_v6  ;;  %v390_v19 = vpop.permute.xlu1 %389  ;;  %v1745_v11 = vrot.slane %v697_v9, %v1574_v35  ;;  %v1750_v13 = vrot.slane %v697_v9, %v1572_v34 }
 0x10f   : > { %v466_v20 = vcombine.low %v462_v15, %v463_v16  ;;  %v392_v21 = vsel %vm391_vm8, %v388_v18, %v390_v19  ;;  %v393_v22 = vsel %vm391_vm8, %v390_v19, %v388_v18  ;;  %v480_v31 = vcombine.high %v441_v17, %v441_v17 }
 0x110   : > { %v405_v23 = vsel %vm1618_vm9, %v1526_v24, %v393_v22  ;;  %v406_v25 = vsel %vm1622_vm10, %v1540_v26, %v392_v21  ;;  %v306_v26 = vld [vmem:[%s2124_s2] sm:$0xff]  ;;  %vm2133_vm3 = vcmp.eq.s32.totalorder %v1745_v11, 1  ;;  %vm706_vm6 = vcmp.ne.s32.totalorder %v1750_v13, 0  ;;  %vm338_vm9 = vmxor %vm332_vm4, %vm1425_vm13 }
 0x111   : > { %v428_v28 = vmul.f32 0.25, %v405_v23  ;;  %v429_v29 = vmul.f32 0.25, %v406_v25  ;;  %v468_v30 = vadd.f32 %v466_v20, %v461_v56  ;;  %vm2132_vm7 = vcmp.eq.s32.totalorder %v1750_v13, 1 }
 0x112   : > { %vm707_vm10 = vcmp.ne.s32.totalorder %v1745_v11, 0  ;;  %v625_v32 = vsel %vm338_vm9, 1, %v1417_v5  ;;  %vm694_vm4 = vcmp.lt.s32.totalorder %v1499_v3, 15 }
 0x113   : > { %v432_v33 = vcombine.low %v428_v28, %v429_v29  ;;  %v491_v36 = vsel %vm2131_vm11, %v480_v31, %v468_v30  ;;  %v483_v37 = vcombine.low %v468_v30, %v468_v30  ;;  %v711_v21 = vsel %vm707_vm10, 1, %v1417_v5 }
 0x114   : > { %557 = vmatprep.subr.mxu0 %v491_v36  ;;  %v1802_v28 = vrot.slane %v625_v32, %v1574_v35  ;;  %v719_v29 = vrot.slane %v711_v21, %v1572_v34 }
 0x115   : > { %v490_v38 = vsel %vm2131_vm11, %v441_v17, %v483_v37  ;;  %v434_v39 = vadd.f32 %v432_v33, %v427_v8  ;;  %v1813_v33 = vrot.slane %v625_v32, %v1572_v34 }
 0x116   : > { %558 = vmatpush1.msra.mxu0 %v490_v38  ;;  %vm721_vm14 = vcmp.eq.s32.totalorder %v719_v29, 1 }
 0x117   : > { %v489_v24 = vsel %vm2131_vm11, %v1493_v1, %v434_v39  ;;  %v477_v40 = vcombine.low %v434_v39, %v434_v39  ;;  %v308_v1 = vld [vmem:[%s2124_s2 + $0x10] sm:$0xff]  ;;  %vm634_vm9 = vcmp.ne.s32.totalorder %v1813_v33, 0 }
 0x118   : > { %559 = vmatprep.subr.mxu0 %v489_v24 }
 0x119   : > { %v488_v41 = vsel %vm2131_vm11, %v1485_v0, %v477_v40  ;;  %v309_v0 = vld [vmem:[%s2124_s2 + $0x18] sm:$0xff]  ;;  %v505_v44 = vpop.permute.xlu0 %504 }
 0x11a   : > { %560 = vmatpush1.msra.mxu0 %v488_v41 }
 0x11b   : > { %1325 = vmatmul.mubr.msk.f32.vlgmr.msra.gmra.mxu0 %vm512_vm12, %v306_v26  ;;  %v510_v43 = vpop.permute.xlu1 %509 }
 0x11c   : > { %599 = vmatprep.mubr.f32.mxu0 %v1420_v27 }
 0x11d   : > { %v500_v50 = vpop.permute.xlu0 %499 }
 0x11f   : > { %1326 = vmatmul.mubr.msk.f32.gmra.mxu0 %vm512_vm12, %v307_v42  ;;  %v495_v45 = vpop.permute.xlu1 %494 }
 0x120   : > { %605 = vmatprep.mubr.f32.mxu0 %v1420_v27 }
 0x123   : > { %1327 = vmatmul.mubr.msk.f32.gmra.mxu0 %vm512_vm12, %v308_v1 }
 0x124   : > { %611 = vmatprep.mubr.f32.mxu0 %v1420_v27 }
 0x127   : > { %1328 = vmatmul.mubr.msk.f32.gmra.mxu0 %vm512_vm12, %v309_v0  ;;  %vm708_vm12 = vmand %vm1755_vm15, %vm706_vm6 }
 0x128   : > { %952 = vmatprep.mubr.f32.mxu0 %v1420_v27  ;;  %v710_v22 = vsel %vm708_vm12, 1, %v1417_v5  ;;  %vm678_vm12 = vcmp.eq.s32.totalorder %v1813_v33, 1 }
 0x129   : > { %v715_v36 = vrot.slane %v710_v22, %v1572_v34 }
 0x12b   : > { %vm720_vm11 = vcmp.eq.s32.totalorder %v715_v36, 1 }
 0x1db   : > { %v595_v46 = vpop.f32.mrf.mxu0 }
 0x1dc   : > { %v1671_v47 = vadd.f32 %v595_v46, %v495_v45 }
 0x1dd   : > { %v597_v48 = vpop.f32.mrf.mxu0 }
 0x1de   : > { %v1673_v49 = vadd.f32 %v597_v48, %v495_v45  ;;  %724 = vrot.lane.b32.xlu1 %v1671_v47, %s1418_s13 }
 0x1df   : > { %v601_v51 = vpop.f32.mrf.mxu0 }
 0x1e0   : > { %v1677_v52 = vadd.f32 %v601_v51, %v500_v50  ;;  %726 = vrot.lane.b32.xlu0 %v1673_v49, %s1418_s13 }
 0x1e1   : > { %v603_v53 = vpop.f32.mrf.mxu0 }
 0x1e2   : > { %v1681_v54 = vadd.f32 %v603_v53, %v500_v50  ;;  %672 = vrot.lane.b32.xlu1 %v1677_v52, %s1419_s14 }
 0x1e3   : > { %v607_v55 = vpop.f32.mrf.mxu0 }
 0x1e4   : > { %674 = vrot.lane.b32.xlu0 %v1681_v54, %s1419_s14  ;;  %v1689_v58 = vadd.f32 %v607_v55, %v505_v44 }
 0x1e5   : > { %v609_v56 = vpop.f32.mrf.mxu0 }
 0x1e6   : > { %777 = vrot.lane.b32.xlu1 %v1677_v52, %s1416_s12  ;;  %v1693_v60 = vadd.f32 %v609_v56, %v505_v44 }
 0x1e7   : > { %v613_v57 = vpop.f32.mrf.mxu0 }
 0x1e8   : > { %779 = vrot.lane.b32.xlu0 %v1681_v54, %s1416_s12  ;;  %v1699_v62 = vadd.f32 %v613_v57, %v510_v43 }
 0x1e9   : > { %v615_v59 = vpop.f32.mrf.mxu0 }
 0x1ea   : > { %v1695_v61 = vadd.f32 %v615_v59, %v510_v43  ;;  %734 = vrot.lane.b32.xlu1 %v1689_v58, %s1418_s13 }
 0x1ec   : > { %831 = vmatprep.subr.mxu1 %v1695_v61  ;;  %736 = vrot.lane.b32.xlu0 %v1693_v60, %s1418_s13  ;;  %s1422_s13 = smov 17  }
 0x1ed   : > { %832 = vmatpush1.msra.mxu1 %v1699_v62 }
 0x1ee   : > { %833 = vmatprep.subr.mxu1 %v1693_v60  ;;  %652 = vrot.lane.b32.xlu1 %v1689_v58, %s1415_s11 }
 0x1ef   : > { %834 = vmatpush1.msra.mxu1 %v1689_v58 }
 0x1f0   : > { %654 = vrot.lane.b32.xlu0 %v1693_v60, %s1415_s11 }
 0x1f2   : > { %690 = vrot.lane.b32.xlu1 %v1689_v58, %s1421_s17 }
 0x1f4   : > { %692 = vrot.lane.b32.xlu0 %v1693_v60, %s1421_s17 }
 0x1f6   : > { %682 = vrot.lane.b32.xlu1 %v1699_v62, %s1419_s14 }
 0x1f8   : > { %684 = vrot.lane.b32.xlu0 %v1695_v61, %s1419_s14  ;;  %s1424_s14 = smov 111  }
 0x1fa   : > { %765 = vrot.lane.b32.xlu1 %v1671_v47, %s1416_s12 }
 0x1fc   : > { %767 = vrot.lane.b32.xlu0 %v1673_v49, %s1416_s12 }
 0x1fe   : > { %664 = vrot.lane.b32.xlu1 %v1699_v62, %s1415_s11 }
 0x200   : > { %666 = vrot.lane.b32.xlu0 %v1695_v61, %s1415_s11 }
 0x202   : > { %618 = vrot.lane.b32.xlu1 %v1699_v62, %s1422_s13 }
 0x204   : > { %620 = vrot.lane.b32.xlu0 %v1695_v61, %s1422_s13 }
 0x206   : > { %742 = vrot.lane.b32.xlu1 %v1677_v52, %s1423_s18 }
 0x208   : > { %744 = vrot.lane.b32.xlu0 %v1681_v54, %s1423_s18 }
 0x20a   : > { %785 = vrot.lane.b32.xlu1 %v1671_v47, %s1424_s14 }
 0x20c   : > { %787 = vrot.lane.b32.xlu0 %v1673_v49, %s1424_s14 }
 0x20e   : > { %810 = vperm.xlu1 %1395, %v315_v63   ;;  %v1920_v63 = vld [vmem:[%s2126_s4] sm:$0xf] }
 0x250   : > { %v725_v2 = vpop.permute.xlu1 %724 }
 0x252   : > { %v727_v6 = vpop.permute.xlu0 %726 }
 0x253   : > { %v1798_v25 = vsel %vm411_vm5, %v727_v6, %v725_v2  ;;  %v1807_v30 = vsel %vm411_vm5, %v725_v2, %v727_v6  ;;  %v751_v2 = vsel %vm634_vm9, 1, %v1417_v5 }
 0x254   : > { %v1737_v7 = vpop.permute.xlu1 %672  ;;  %v756_v32 = vrot.slane %v751_v2, %v1572_v34 }
 0x256   : > { %v1739_v8 = vpop.permute.xlu0 %674 }
 0x257   : > { %v1870_v4 = vsel %vm391_vm8, %v1737_v7, %v1739_v8  ;;  %v1882_v45 = vsel %vm391_vm8, %v1739_v8, %v1737_v7 }
 0x258   : > { %v1742_v10 = vpop.permute.xlu1 %777 }
 0x25a   : > { %v1747_v12 = vpop.permute.xlu0 %779 }
 0x25b   : > { %v782_v15 = vsel %vm360_vm1, %v1747_v12, %v1742_v10 }
 0x25c   : > { %v735_v14 = vpop.permute.xlu1 %734 }
 0x25e   : > { %v737_v16 = vpop.permute.xlu0 %736 }
 0x25f   : > { %v1764_v17 = vsel %vm411_vm5, %v735_v14, %v737_v16  ;;  %v1768_v18 = vsel %vm411_vm5, %v737_v16, %v735_v14  ;;  %vm679_vm5 = vcmp.eq.s32.totalorder %v1802_v28, 1 }
 0x260   : > { %1338 = vmatprep.subr.msk.mxu0 %vm2133_vm3, %v1768_v18  ;;  %v1777_v19 = vpop.permute.xlu1 %652 }
 0x261   : > { %1339 = vmatpush1.msk.msra.mxu0 %vm2132_vm7, %v1764_v17 }
 0x262   : > { %v1786_v20 = vpop.permute.xlu0 %654  ;;  %904 = vmatprep.subr.mxu0 %v1695_v61 }
 0x263   : > { %905 = vmatpush1.msra.mxu0 %v1699_v62  ;;  %v656_v57 = vsel %vm328_vm0, %v1777_v19, %v1786_v20  ;;  %v657_v6 = vsel %vm328_vm0, %v1786_v20, %v1777_v19  ;;  %v794_v19 = vsel %vm706_vm6, 1, %v1417_v5  ;;  %vm789_vm6 = vcmp.lt.s32.totalorder %v1499_v3, 111 }
 0x264   : > { %906 = vmatprep.subr.mxu0 %v1693_v60  ;;  %v691_v23 = vpop.permute.xlu1 %690 }
 0x265   : > { %907 = vmatpush1.msra.mxu0 %v1689_v58 }
 0x266   : > { %v693_v31 = vpop.permute.xlu0 %692  ;;  %1340 = vmatprep.subr.msk.mxu0 %vm2133_vm3, %v1798_v25  ;;  %vm636_vm3 = vmand %vm1755_vm15, %vm634_vm9 }
 0x267   : > { %1341 = vmatpush1.msk.msra.mxu0 %vm2132_vm7, %v1807_v30  ;;  %v695_v38 = vsel %vm694_vm4, %v691_v23, %v693_v31  ;;  %vm635_vm7 = vcmp.ne.s32.totalorder %v1802_v28, 0  ;;  %v696_v40 = vsel %vm694_vm4, %v693_v31, %v691_v23  ;;  %vm1855_vm4 = vmxor %vm331_vm2, %vm1425_vm13  ;;  %v638_v0 = vsel %vm636_vm3, 1, %v1417_v5 }
 0x268   : > { %910 = vmatprep.subr.mxu0 %v1681_v54  ;;  %v683_v35 = vpop.permute.xlu1 %682  ;;  %v639_v1 = vsel %vm635_vm7, 1, %v1417_v5  ;;  %vm750_vm2 = vmand %vm1855_vm4, %vm635_vm7  ;;  %v643_v48 = vrot.slane %v638_v0, %v1572_v34  ;;  %vm813_vm3 = vcmask 588800   ;;  %v799_v23 = vrot.slane %v794_v19, %v1572_v34 }
 0x269   : > { %911 = vmatpush1.msra.mxu0 %v1677_v52  ;;  %v647_v44 = vrot.slane %v639_v1, %v1572_v34  ;;  %v752_v56 = vsel %vm750_vm2, 1, %v1417_v5  ;;  %vm2151_vm2 = vcmp.eq.s32.totalorder %v1750_v13, 1 }
 0x26a   : > { %v685_v37 = vpop.permute.xlu0 %684  ;;  %912 = vmatprep.subr.mxu0 %v1673_v49  ;;  %vm648_vm7 = vcmp.eq.s32.totalorder %v643_v48, 1  ;;  %v760_v16 = vrot.slane %v752_v56, %v1572_v34  ;;  %vm804_vm9 = vcmp.eq.s32.totalorder %v799_v23, 1 }
 0x26b   : > { %v1830_v39 = vsel %vm391_vm8, %v683_v35, %v685_v37  ;;  %v1834_v24 = vsel %vm391_vm8, %v685_v37, %v683_v35  ;;  %913 = vmatpush1.msra.mxu0 %v1671_v47  ;;  %vm1899_vm8 = vmand %vm1855_vm4, %vm707_vm10  ;;  %vm1913_vm13 = vcmp.eq.s32.totalorder %v647_v44, 1  ;;  %vm761_vm10 = vcmp.eq.s32.totalorder %v756_v32, 1 }
 0x26c   : > { %1329 = vmatprep.subr.msk.mxu1 %vm679_vm5, %v1830_v39  ;;  %1342 = vmatprep.subr.msk.mxu0 %vm721_vm14, %v695_v38  ;;  %v1843_v26 = vpop.permute.xlu1 %765  ;;  %v795_v8 = vsel %vm1899_vm8, 1, %v1417_v5  ;;  %v781_v5 = vsel %vm360_vm1, %v1742_v10, %v1747_v12  ;;  %vm2153_vm8 = vmmov %vm2151_vm2 }
 0x26d   : > { %1330 = vmatpush1.msk.msra.mxu1 %vm678_vm12, %v1834_v24  ;;  %1343 = vmatpush1.msk.msra.mxu0 %vm720_vm11, %v696_v40  ;;  %vm622_vm11 = vcmp.lt.s32.totalorder %v1499_v3, 17  ;;  %v803_v21 = vrot.slane %v795_v8, %v1572_v34 }
 0x26e   : > { %v768_v42 = vpop.permute.xlu0 %767  ;;  %837 = vmatprep.subr.mxu1 %v1681_v54 }
 0x26f   : > { %838 = vmatpush1.msra.mxu1 %v1677_v52  ;;  %v770_v29 = vsel %vm360_vm1, %v768_v42, %v1843_v26  ;;  %v769_v10 = vsel %vm360_vm1, %v1843_v26, %v768_v42  ;;  %vm805_vm14 = vcmp.eq.s32.totalorder %v803_v21, 1  ;;  %vm2150_vm1 = vcmp.eq.s32.totalorder %v1745_v11, 1 }
 0x270   : > { %839 = vmatprep.subr.mxu1 %v1673_v49  ;;  %v665_v43 = vpop.permute.xlu1 %664 }
 0x271   : > { %840 = vmatpush1.msra.mxu1 %v1671_v47 }
 0x272   : > { %v667_v46 = vpop.permute.xlu0 %666  ;;  %1331 = vmatprep.subr.msk.mxu1 %vm679_vm5, %v1870_v4 }
 0x273   : > { %v669_v50 = vsel %vm328_vm0, %v667_v46, %v665_v43  ;;  %1332 = vmatpush1.msk.msra.mxu1 %vm678_vm12, %v1882_v45  ;;  %v668_v51 = vsel %vm328_vm0, %v665_v43, %v667_v46  ;;  %vm746_vm0 = vcmp.lt.s32.totalorder %v1499_v3, 113 }
 0x274   : > { %843 = vmatprep.subr.mxu1 %v668_v51  ;;  %916 = vmatprep.subr.mxu0 %v668_v51  ;;  %v619_v55 = vpop.permute.xlu1 %618 }
 0x275   : > { %1333 = vmatpush1.msk.msra.mxu1 %vm1755_vm15, %v669_v50  ;;  %1344 = vmatpush1.msk.msra.mxu0 %vm1755_vm15, %v669_v50 }
 0x276   : > { %v621_v7 = vpop.permute.xlu0 %620  ;;  %845 = vmatprep.subr.mxu1 %v656_v57  ;;  %918 = vmatprep.subr.mxu0 %v656_v57 }
 0x277   : > { %v623_v9 = vsel %vm622_vm11, %v619_v55, %v621_v7  ;;  %v624_v14 = vsel %vm622_vm11, %v621_v7, %v619_v55  ;;  %1334 = vmatpush1.msk.msra.mxu1 %vm1755_vm15, %v657_v6  ;;  %1345 = vmatpush1.msk.msra.mxu0 %vm1755_vm15, %v657_v6  ;;  %vm762_vm15 = vcmp.eq.s32.totalorder %v760_v16, 1 }
 0x278   : > { %1335 = vmatprep.subr.msk.mxu1 %vm1913_vm13, %v623_v9  ;;  %1346 = vmatmul.mubr.msk.f32.vlgmr.msra.gmra.mxu0 %vm813_vm3, %v1920_v63  ;;  %v743_v20 = vpop.permute.xlu1 %742 }
 0x279   : > { %1336 = vmatpush1.msk.msra.mxu1 %vm648_vm7, %v624_v14  ;;  %1094 = vmatprep.mubr.f32.mxu0 %v1420_v27 }
 0x27a   : > { %v745_v22 = vpop.permute.xlu0 %744  ;;  %1337 = vmatmul.mubr.msk.f32.vlgmr.msra.gmra.mxu1 %vm813_vm3, %v1920_v63  ;;  %1347 = vmatprep.subr.msk.mxu1 %vm1855_vm4, %v782_v15 }
 0x27b   : > { %974 = vmatpush1.msra.mxu1 %v781_v5  ;;  %1023 = vmatprep.mubr.f32.mxu1 %v1420_v27  ;;  %v748_v34 = vsel %vm746_vm0, %v745_v22, %v743_v20  ;;  %v747_v12 = vsel %vm746_vm0, %v743_v20, %v745_v22 }
 0x27c   : > { %1348 = vmatprep.subr.msk.mxu1 %vm1855_vm4, %v770_v29  ;;  %v786_v31 = vpop.permute.xlu1 %785 }
 0x27d   : > { %976 = vmatpush1.msra.mxu1 %v769_v10 }
 0x27e   : > { %v788_v27 = vpop.permute.xlu0 %787  ;;  %1349 = vmatprep.subr.msk.mxu1 %vm762_vm15, %v748_v34 }
 0x27f   : > { %v790_v36 = vsel %vm789_vm6, %v786_v31, %v788_v27  ;;  %v791_v35 = vsel %vm789_vm6, %v788_v27, %v786_v31  ;;  %1350 = vmatpush1.msk.msra.mxu1 %vm761_vm10, %v747_v12 }
 0x280   : > { %979 = vmatprep.subr.mxu1 %v1695_v61  ;;  %1356 = vmatprep.subr.msk.mxu0 %vm805_vm14, %v791_v35 }
 0x281   : > { %980 = vmatpush1.msra.mxu1 %v1699_v62  ;;  %1357 = vmatpush1.msk.msra.mxu0 %vm804_vm9, %v790_v36 }
 0x282   : > { %981 = vmatprep.subr.mxu1 %v1693_v60  ;;  %1358 = vmatprep.subr.msk.mxu0 %vm1855_vm4, %v782_v15 }
 0x283   : > { %982 = vmatpush1.msra.mxu1 %v1689_v58  ;;  %1047 = vmatpush1.msra.mxu0 %v781_v5 }
 0x284   : > { %1351 = vmatprep.subr.msk.mxu1 %vm679_vm5, %v1830_v39  ;;  %1359 = vmatprep.subr.msk.mxu0 %vm1855_vm4, %v770_v29  ;;  %vm2152_vm4 = vmmov %vm2150_vm1 }
 0x285   : > { %1352 = vmatpush1.msk.msra.mxu1 %vm678_vm12, %v1834_v24  ;;  %1049 = vmatpush1.msra.mxu0 %v769_v10 }
 0x286   : > { %985 = vmatprep.subr.mxu1 %v1681_v54  ;;  %1360 = vmatprep.subr.msk.mxu0 %vm2150_vm1, %v1768_v18 }
 0x287   : > { %986 = vmatpush1.msra.mxu1 %v1677_v52  ;;  %1361 = vmatpush1.msk.msra.mxu0 %vm2151_vm2, %v1764_v17 }
 0x288   : > { %987 = vmatprep.subr.mxu1 %v1673_v49  ;;  %1052 = vmatprep.subr.mxu0 %v1695_v61 }
 0x289   : > { %988 = vmatpush1.msra.mxu1 %v1671_v47  ;;  %1053 = vmatpush1.msra.mxu0 %v1699_v62 }
 0x28a   : > { %1353 = vmatprep.subr.msk.mxu1 %vm679_vm5, %v1870_v4  ;;  %1054 = vmatprep.subr.mxu0 %v1693_v60  ;;  %v811_v60 = vpop.permute.xlu1 %810  ;;  %vm2154_vm5 = vcmask 1043456  }
 0x28b   : > { %1354 = vmatpush1.msk.msra.mxu1 %vm678_vm12, %v1882_v45  ;;  %1055 = vmatpush1.msra.mxu0 %v1689_v58  ;;  %vm2155_vm12 = vmmov %vm2154_vm5 }
 0x28c   : > { %1355 = vmatmul.mubr.msk.f32.vlgmr.msra.gmra.mxu1 %vm813_vm3, %v1920_v63  ;;  %1362 = vmatprep.subr.msk.mxu0 %vm2152_vm4, %v1798_v25  ;;  %vm2156_vm11 = vmmov %vm2154_vm5 }
 0x28d   : > { %1363 = vmatpush1.msk.msra.mxu0 %vm2153_vm8, %v1807_v30  ;;  %vm2157_vm13 = vmmov %vm2154_vm5 }
 0x28e   : > { %1058 = vmatprep.subr.mxu0 %v1681_v54 }
 0x28f   : > { %1059 = vmatpush1.msra.mxu0 %v1677_v52 }
 0x290   : > { %1060 = vmatprep.subr.mxu0 %v1673_v49 }
 0x291   : > { %1061 = vmatpush1.msra.mxu0 %v1671_v47 }
 0x292   : > { %1364 = vmatmul.mubr.msk.f32.vlgmr.msra.gmra.mxu0 %vm813_vm3, %v1920_v63  ;;  %vm2158_vm3 = vmmov %vm2154_vm5 }
 0x293   : > { %vm2159_vm7 = vmmov %vm2158_vm3 }
 0x294   : > { %vm2160_vm0 = vmmov %vm2158_vm3 }
 0x295   : > { %vm2161_vm15 = vmmov %vm2160_vm0 }
 0x296   : > { %vm2162_vm6 = vmmov %vm2160_vm0 }
 0x297   : > { %vm2163_vm10 = vmmov %vm2160_vm0 }
 0x298   : > { %vm2164_vm14 = vmmov %vm2160_vm0 }
 0x299   : > { %vm2165_vm9 = vmmov %vm2160_vm0 }
 0x29a   : > { %vm2166_vm1 = vmmov %vm2160_vm0 }
 0x29b   : > { %vm2167_vm2 = vmmov %vm2160_vm0 }
 0x29c   : > { %vm2168_vm4 = vmmov %vm2160_vm0 }
 0x29d   : > { %vm2169_vm8 = vmmov %vm2160_vm0 }
 0x338   : > { %v954_v11 = vpop.f32.mrf.mxu0 }
 0x339   : > { %v2033_v13 = vadd.f32 %v954_v11, %v811_v60 }
 0x33a   : > { %v883_v3 = vpop.f32.mrf.mxu1  ;;  %v956_v52 = vpop.f32.mrf.mxu0 }
 0x33b   : > { %v2029_v62 = vadd.f32 %v883_v3, %v811_v60  ;;  %v1127_v28 = vmul.f32 %v2033_v13, %v2033_v13  ;;  %v2045_v33 = vadd.f32 %v956_v52, %v811_v60  ;;  %v1104_v38 = vsel %vm2158_vm3, %v2033_v13, 0.0  ;;  %v316_v52 = vld [vmem:[%s2128_s6] sm:$0xff] }
 0x33c   : > { %v885_v58 = vpop.f32.mrf.mxu1 }
 0x33d   : > { %v2027_v61 = vadd.f32 %v885_v58, %v811_v60  ;;  %v1125_v49 = vmul.f32 %v2029_v62, %v2029_v62  ;;  %v1101_v17 = vsel %vm2155_vm12, %v2029_v62, 0.0  ;;  %v1136_v24 = vsel %vm2159_vm7, %v1127_v28, 0.0  ;;  %v320_v28 = vld [vmem:[%s2129_s7] sm:$0xff] }
 0x33e   : > { %v1128_v40 = vmul.f32 %v2045_v33, %v2045_v33  ;;  %v1106_v42 = vsel %vm2160_vm0, %v2045_v33, 0.0 }
 0x33f   : > { %v1126_v54 = vmul.f32 %v2027_v61, %v2027_v61  ;;  %v1102_v47 = vsel %vm2154_vm5, %v2027_v61, 0.0  ;;  %v1133_v30 = vsel %vm2157_vm13, %v1125_v49, 0.0 }
 0x340   : > { %v1103_v25 = vadd.f32 %v1102_v47, %v1101_v17  ;;  %v1138_v4 = vsel %vm2161_vm15, %v1128_v40, 0.0  ;;  %v317_v17 = vld [vmem:[%s2128_s6 + $0x8] sm:$0xff] }
 0x341   : > { %v1134_v18 = vsel %vm2156_vm11, %v1126_v54, 0.0  ;;  %v1188_v40 = vcombine.high %v317_v17, %v317_v17 }
 0x342   : > { %v1135_v37 = vadd.f32 %v1134_v18, %v1133_v30  ;;  %v1105_v39 = vadd.f32 %v1104_v38, %v1103_v25  ;;  %v318_v18 = vld [vmem:[%s2128_s6 + $0x10] sm:$0xff]  ;;  %v319_v25 = vld [vmem:[%s2128_s6 + $0x18] sm:$0xff] }
 0x343   : > { %v322_v38 = vld [vmem:[%s2129_s7 + $0x10] sm:$0xff] }
 0x344   : > { %v1137_v26 = vadd.f32 %v1136_v24, %v1135_v37  ;;  %v1107_v0 = vadd.f32 %v1106_v42, %v1105_v39  ;;  %v321_v37 = vld [vmem:[%s2129_s7 + $0x8] sm:$0xff]  ;;  %v323_v39 = vld [vmem:[%s2129_s7 + $0x18] sm:$0xff]  ;;  %v1187_v24 = vcombine.high %v316_v52, %v316_v52  ;;  %v1207_v42 = vcombine.high %v320_v28, %v320_v28 }
 0x346   : > { %v1139_v50 = vadd.f32 %v1138_v4, %v1137_v26  ;;  %v1189_v26 = vcombine.high %v318_v18, %v318_v18  ;;  %v1209_v4 = vcombine.high %v322_v38, %v322_v38 }
 0x34c   : > { %v1025_v41 = vpop.f32.mrf.mxu1 }
 0x34d   : > { %v2054_v1 = vadd.f32 %v1025_v41, %v811_v60  ;;  %v1190_v41 = vcombine.high %v319_v25, %v319_v25 }
 0x34e   : > { %v1027_v43 = vpop.f32.mrf.mxu1 }
 0x34f   : > { %v1108_v44 = vsel %vm2162_vm6, %v2054_v1, 0.0  ;;  %v1129_v45 = vmul.f32 %v2054_v1, %v2054_v1  ;;  %v2061_v46 = vadd.f32 %v1027_v43, %v811_v60  ;;  %v1208_v43 = vcombine.high %v321_v37, %v321_v37 }
 0x350   : > { %v1109_v48 = vadd.f32 %v1108_v44, %v1107_v0  ;;  %v1210_v44 = vcombine.high %v323_v39, %v323_v39 }
 0x351   : > { %v1140_v51 = vsel %vm2163_vm10, %v1129_v45, 0.0  ;;  %v1110_v53 = vsel %vm2164_vm14, %v2061_v46, 0.0  ;;  %v1130_v55 = vmul.f32 %v2061_v46, %v2061_v46 }
 0x352   : > { %v1096_v56 = vpop.f32.mrf.mxu0  ;;  %v1141_v57 = vadd.f32 %v1140_v51, %v1139_v50  ;;  %v1111_v6 = vadd.f32 %v1110_v53, %v1109_v48 }
 0x353   : > { %v2068_v59 = vadd.f32 %v1096_v56, %v811_v60  ;;  %v1142_v63 = vsel %vm2165_vm9, %v1130_v55, 0.0 }
 0x354   : > { %v1098_v2 = vpop.f32.mrf.mxu0  ;;  %v1143_v16 = vadd.f32 %v1142_v63, %v1141_v57 }
 0x355   : > { %v1131_v7 = vmul.f32 %v2068_v59, %v2068_v59  ;;  %v2073_v8 = vadd.f32 %v1098_v2, %v811_v60  ;;  %v1112_v9 = vsel %vm2166_vm1, %v2068_v59, 0.0 }
 0x356   : > { %v1113_v14 = vadd.f32 %v1112_v9, %v1111_v6 }
 0x357   : > { %v1114_v19 = vsel %vm2167_vm2, %v2073_v8, 0.0  ;;  %v1132_v20 = vmul.f32 %v2073_v8, %v2073_v8  ;;  %v1144_v32 = vsel %vm2168_vm4, %v1131_v7, 0.0 }
 0x358   : > { %v1115_v15 = vadd.f32 %v1114_v19, %v1113_v14  ;;  %v1145_v21 = vadd.f32 %v1144_v32, %v1143_v16 }
 0x359   : > { %v1146_v5 = vsel %vm2169_vm8, %v1132_v20, 0.0 }
 0x35a   : > { %1116 = vadd.xlane.f32.xlu0 %v1115_v15  ;;  %v1147_v22 = vadd.f32 %v1146_v5, %v1145_v21 }
 0x35c   : > { %1148 = vadd.xlane.f32.xlu1 %v1147_v22 }
 0x3e3   : > { %v1117_v23 = vpop.xlane.xlu0 %1116 }
 0x3e4   : > { %v1118_v29 = vrot.slane %v1117_v23, 4 }
 0x3e5   : > { %v1149_v10 = vpop.xlane.xlu1 %1148 }
 0x3e6   : > { %v1119_v34 = vadd.f32 %v1118_v29, %v1117_v23  ;;  %v1150_v12 = vrot.slane %v1149_v10, 4 }
 0x3e8   : > { %v1120_v31 = vrot.slane %v1119_v34, 2  ;;  %v1151_v27 = vadd.f32 %v1150_v12, %v1149_v10 }
 0x3ea   : > { %v1152_v36 = vrot.slane %v1151_v27, 2  ;;  %v1121_v35 = vadd.f32 %v1120_v31, %v1119_v34 }
 0x3ec   : > { %v1153_v3 = vadd.f32 %v1152_v36, %v1151_v27  ;;  %v1122_v58 = vrot.slane %v1121_v35, 1 }
 0x3ee   : > { %v1123_v60 = vadd.f32 %v1122_v58, %v1121_v35  ;;  %v1154_v11 = vrot.slane %v1153_v3, 1 }
 0x3f0   : > { %1369 = vpush %v1123_v60  ;;  %v1155_v54 = vadd.f32 %v1154_v11, %v1153_v3 }
 0x3f2   : > { %1371 = vpush %v1155_v54 }
 0x421   : > { %s1370_s21 = spop %1369 }
 0x422   : > { %s1157_s22 = smul.f32 0.00024414063, %s1370_s21 }
 0x423   : > { %s1372_s23 = spop %1371 }
 0x424   : > { %s1159_s24 = smul.f32 %s1157_s22, %s1157_s22  ;;  %v1161_v30 = vstv %s1157_s22 }
 0x425   : > { %s1158_s25 = smul.f32 0.00024414063, %s1372_s23  ;;  %v1162_v0 = vsub.f32 %v2029_v62, %v1161_v30  ;;  %v1163_v45 = vsub.f32 %v2027_v61, %v1161_v30  ;;  %v1164_v48 = vsub.f32 %v2033_v13, %v1161_v30  ;;  %v1165_v50 = vsub.f32 %v2045_v33, %v1161_v30 }
 0x426   : > { %v1166_v51 = vsub.f32 %v2054_v1, %v1161_v30  ;;  %v1167_v53 = vsub.f32 %v2061_v46, %v1161_v30  ;;  %v1168_v55 = vsub.f32 %v2068_v59, %v1161_v30  ;;  %v1169_v56 = vsub.f32 %v2073_v8, %v1161_v30 }
 0x427   : > { %s1160_s26 = ssub.f32 %s1158_s25, %s1159_s24  ;;  %s1368_s25 = sshll.u32 %s2171_s28, 5 }
 0x428   : > { %s305_s30 = scalar_lea.vmem %s2130_s8, %s1368_s25 }
 0x429   : > { %s1170_s29 = sadd.f32 1e-05, %s1160_s26 }
 0x42b   : > { %v1171_v49 = vstv %s1170_s29 }
 0x42c   : > { %1405 = vrsqrt.f32 %v1171_v49 }
 0x439   : > { %v1406_v47 = vpop.eup %1405 }
 0x43a   : > { %1373 = vpush %v1406_v47 }
 0x46b   : > { %s1374_s22 = spop %1373 }
 0x46c   : > { %v1174_v57 = vstv %s1374_s22 }
 0x46d   : > { %v1175_v62 = vmul.f32 %v1174_v57, %v1162_v0  ;;  %v1176_v63 = vmul.f32 %v1174_v57, %v1163_v45  ;;  %v1177_v2 = vmul.f32 %v1174_v57, %v1164_v48  ;;  %v1178_v6 = vmul.f32 %v1174_v57, %v1165_v50 }
 0x46e   : > { %v1179_v7 = vmul.f32 %v1174_v57, %v1166_v51  ;;  %v1180_v61 = vmul.f32 %v1174_v57, %v1167_v53  ;;  %v1181_v9 = vmul.f32 %v1174_v57, %v1168_v55  ;;  %v1182_v13 = vmul.f32 %v1174_v57, %v1169_v56 }
 0x46f   : > { %v1195_v14 = vmul.f32 %v1175_v62, %v316_v52  ;;  %v1196_v33 = vmul.f32 %v1187_v24, %v1176_v63  ;;  %v1197_v1 = vmul.f32 %v1177_v2, %v317_v17  ;;  %v1198_v16 = vmul.f32 %v1188_v40, %v1178_v6 }
 0x470   : > { %v1199_v19 = vmul.f32 %v1179_v7, %v318_v18  ;;  %v1200_v46 = vmul.f32 %v1189_v26, %v1180_v61  ;;  %v1201_v20 = vmul.f32 %v1181_v9, %v319_v25  ;;  %v1202_v59 = vmul.f32 %v1190_v41, %v1182_v13 }
 0x471   : > { %v1215_v32 = vadd.f32 %v1195_v14, %v320_v28  ;;  %v1216_v8 = vadd.f32 %v1207_v42, %v1196_v33  ;;  %v1217_v15 = vadd.f32 %v1197_v1, %v321_v37  ;;  %v1218_v21 = vadd.f32 %v1208_v43, %v1198_v16 }
 0x472   : > { %v1219_v5 = vadd.f32 %v1199_v19, %v322_v38  ;;  %v1220_v22 = vadd.f32 %v1209_v4, %v1200_v46  ;;  %v1221_v23 = vadd.f32 %v1201_v20, %v323_v39  ;;  %v1222_v29 = vadd.f32 %v1210_v44, %v1202_v59 }
 0x473   : > { %v1223_v10 = vmax.f32 %v1215_v32, 0.0  ;;  %v1224_v34 = vmax.f32 %v1216_v8, 0.0  ;;  %v1225_v12 = vmax.f32 %v1217_v15, 0.0  ;;  %v1226_v31 = vmax.f32 %v1218_v21, 0.0 }
 0x474   : > { %v1227_v27 = vmax.f32 %v1219_v5, 0.0  ;;  %v1228_v36 = vmax.f32 %v1220_v22, 0.0  ;;  %v1229_v35 = vmax.f32 %v1221_v23, 0.0  ;;  %v1230_v3 = vmax.f32 %v1222_v29, 0.0 }
 0x475   : > { %v1231_v58 = vmin.f32 %v1223_v10, 6.0  ;;  %v1232_v60 = vmin.f32 %v1224_v34, 6.0  ;;  %v1233_v11 = vmin.f32 %v1225_v12, 6.0  ;;  %v1234_v54 = vmin.f32 %v1226_v31, 6.0 }
 0x476   : > { %v1235_v49 = vmin.f32 %v1227_v27, 6.0  ;;  %v1236_v47 = vmin.f32 %v1228_v36, 6.0  ;;  %v1237_v52 = vmin.f32 %v1229_v35, 6.0  ;;  %v1238_v17 = vmin.f32 %v1230_v3, 6.0 }
 0x477   : > { %v1247_v18 = vcombine.low %v1231_v58, %v1232_v60  ;;  %v1248_v25 = vcombine.low %v1233_v11, %v1234_v54 }
 0x478   : > { %v1249_v28 = vcombine.low %v1235_v49, %v1236_v47  ;;  %v1250_v30 = vcombine.low %v1237_v52, %v1238_v17 }
 0x479   : > { %1255 = vst [vmem:[%s305_s30] sm:$0xff] %v1247_v18  ;;  %1256 = vst [vmem:[%s305_s30 + $0x8] sm:$0xff] %v1248_v25 }
 0x47a   : > { %1257 = vst [vmem:[%s305_s30 + $0x10] sm:$0xff] %v1249_v28  ;;  %1258 = vst [vmem:[%s305_s30 + $0x18] sm:$0xff] %v1250_v30 }
 0x47b PF: > { %s18_s27 = sadd.s32 1, %s1413_s27  }
 0x47c   : > { %p15_p4 = scmp.ge.s32.totalorder %s18_s27, 4  }
 0x47e   :  { %17 = sbr.rel (!%p15_p4) target bundleno = 1 (0x1), region = 82 }

</bundles_post_ra>
